<compile_context>
chip_gen: v7x
topology: tpu7x:2x2x1
jax: 0.10.0
libtpu: 0.0.40
codegen_flags: <defaults>
</compile_context>

<pallas_src>
import functools

import jax
import jax.numpy as jnp
from jax.experimental import pallas as pl
from jax.experimental.pallas import tpu as pltpu

LANE = 128


def _round_up(x, m):
    return ((x + m - 1) // m) * m


def channel_attention_kernel(x_ref, w1t_ref, b1_ref, w2t_ref, b2_ref,
                             o_ref, acc_ref, *, hw_groups, inv_hw):
    # x_ref:  (n_blk, C, hw_blk) spatial tile of the input
    # w1t_ref:(C, Cr)  b1_ref:(1, Cr)   w2t_ref:(Cr, C)  b2_ref:(1, C)
    # o_ref:  (n_blk, C)
    # acc_ref:(n_blk, C, 128) fp32 lane-wise partial-sum accumulator
    j = pl.program_id(1)

    @pl.when(j == 0)
    def _():
        acc_ref[...] = jnp.zeros_like(acc_ref)

    # Upcast per tile (keeps HBM traffic at the input dtype width).
    xt = x_ref[...].astype(jnp.float32)            # (n_blk, C, hw_blk)

    # Lane-wise VPU accumulation: fold hw_blk into 128-lane groups with plain
    # adds (no per-step XLU reduce). Slices are 128-aligned -> vreg-aligned.
    acc = acc_ref[...]
    for g in range(hw_groups):
        acc = acc + xt[:, :, g * LANE:(g + 1) * LANE]
    acc_ref[...] = acc

    # Epilogue: one cross-lane reduce + the two tiny 1x1-conv matmuls, once
    # per row-tile (not per spatial tile).
    @pl.when(j == pl.num_programs(1) - 1)
    def _():
        gap = jnp.sum(acc_ref[...], axis=-1) * inv_hw          # (n_blk, C)
        h = jnp.dot(gap, w1t_ref[...], preferred_element_type=jnp.float32)
        h = jnp.maximum(h + b1_ref[...], 0.0)                  # (n_blk, Cr)
        y = jnp.dot(h, w2t_ref[...], preferred_element_type=jnp.float32)
        y = y + b2_ref[...]                                    # (n_blk, C)
        o_ref[...] = y.astype(o_ref.dtype)


def channel_attention(x_nchw, w1, b1, w2, b2, *, vmem_tile_bytes=8 * 1024 * 1024):
    """x_nchw: (N, C, H, W); w1: (C//r, C); b1: (C//r,); w2: (C, C//r); b2: (C,).
    Returns (N, C, 1, 1), matching the PyTorch module's output."""
    N, C, H, W = x_nchw.shape
    Cr = w1.shape[0]
    HW = H * W

    # Keep the input dtype — no wrapper-side fp32 upcast (extra HBM pass).
    x3 = x_nchw.reshape(N, C, HW)
    itemsize = jnp.dtype(x3.dtype).itemsize

    # Batch tile: multiple of 8 (sublane constraint on the output block) or
    # the full batch.
    n_blk = 8 if (N % 8 == 0) else N

    # Spatial tile: a multiple of 128 lanes, sized so one pipeline buffer stays
    # under `vmem_tile_bytes` (BlockSpec double-buffers it) — safe headroom on
    # v7x's 64 MiB physical VMEM while keeping tiles >= 128 lanes.
    max_hw = max(LANE, (vmem_tile_bytes // (n_blk * C * itemsize)) // LANE * LANE)
    hw_blk = min(max_hw, _round_up(HW, LANE))
    HW_pad = _round_up(HW, hw_blk)
    if HW_pad != HW:
        # Zero-pad the spatial tail: zeros don't change the partial sums and
        # we divide by the true H*W below.
        x3 = jnp.pad(x3, ((0, 0), (0, 0), (0, HW_pad - HW)))

    # Weights pre-transposed so the kernel does plain row-major matmuls.
    w1t = jnp.transpose(w1).astype(jnp.float32)     # (C, Cr)
    w2t = jnp.transpose(w2).astype(jnp.float32)     # (Cr, C)
    b1r = b1.reshape(1, Cr).astype(jnp.float32)
    b2r = b2.reshape(1, C).astype(jnp.float32)

    grid = (N // n_blk, HW_pad // hw_blk)
    kernel = functools.partial(channel_attention_kernel,
                               hw_groups=hw_blk // LANE,
                               inv_hw=float(1.0 / HW))

    cost = pl.CostEstimate(
        flops=N * C * HW + 4 * N * C * Cr,
        transcendentals=0,
        bytes_accessed=N * C * HW * itemsize
        + (2 * C * Cr + C + Cr) * 4
        + N * C * itemsize,
    )

    out = pl.pallas_call(
        kernel,
        out_shape=jax.ShapeDtypeStruct((N, C), x_nchw.dtype),
        grid_spec=pltpu.PrefetchScalarGridSpec(
            num_scalar_prefetch=0,
            grid=grid,
            in_specs=[
                # Streamed input tile.
                pl.BlockSpec((n_blk, C, hw_blk), lambda i, j: (i, 0, j)),
                # Constants: stay resident across all grid steps.
                pl.BlockSpec((C, Cr), lambda i, j: (0, 0)),
                pl.BlockSpec((1, Cr), lambda i, j: (0, 0)),
                pl.BlockSpec((Cr, C), lambda i, j: (0, 0)),
                pl.BlockSpec((1, C), lambda i, j: (0, 0)),
            ],
            out_specs=pl.BlockSpec((n_blk, C), lambda i, j: (i, 0)),
            scratch_shapes=[pltpu.VMEM((n_blk, C, LANE), jnp.float32)],
        ),
        compiler_params=pltpu.CompilerParams(
            dimension_semantics=("parallel", "arbitrary")),
        cost_estimate=cost,
    )(x3, w1t, b1r, w2t, b2r)

    return out.reshape(N, C, 1, 1)


def _reference(x_nchw, w1, b1, w2, b2):
    gap = jnp.mean(x_nchw.astype(jnp.float32), axis=(2, 3))    # (N, C)
    h = jnp.maximum(gap @ w1.T + b1, 0.0)                      # (N, C//r)
    y = h @ w2.T + b2                                          # (N, C)
    return y.reshape(*y.shape, 1, 1)


if __name__ == "__main__":
    # Module hyperparams: dim=32, reduction=8 -> hidden = 4.
    N, C, H, W = 2, 32, 16, 16
    reduction = 8
    Cr = C // reduction

    key = jax.random.PRNGKey(0)
    kx, kw1, kb1, kw2, kb2 = jax.random.split(key, 5)

    x = jax.random.normal(kx, (N, C, H, W), dtype=jnp.float32)
    # Conv2d 1x1 weights squeezed to 2D: (out_channels, in_channels).
    w1 = jax.random.normal(kw1, (Cr, C), dtype=jnp.float32) * 0.1
    b1 = jax.random.normal(kb1, (Cr,), dtype=jnp.float32) * 0.1
    w2 = jax.random.normal(kw2, (C, Cr), dtype=jnp.float32) * 0.1
    b2 = jax.random.normal(kb2, (C,), dtype=jnp.float32) * 0.1

    out = channel_attention(x, w1, b1, w2, b2)
    out = jax.block_until_ready(out)

    ref = _reference(x, w1, b1, w2, b2)
    assert out.shape == (N, C, 1, 1), out.shape
    assert jnp.allclose(out, ref, atol=1e-4, rtol=1e-4), "mismatch vs reference"

    print("KERNEL_OK")
</pallas_src>

<mosaic_0001>
module attributes {stable_mosaic.version = 11 : i64} {
  func.func @channel_attention_kernel(%arg0: i32, %arg1: i32, %arg2: memref<2x32x256xf32, #tpu.memory_space<vmem>>, %arg3: memref<32x4xf32, #tpu.memory_space<vmem>>, %arg4: memref<1x4xf32, #tpu.memory_space<vmem>>, %arg5: memref<4x32xf32, #tpu.memory_space<vmem>>, %arg6: memref<1x32xf32, #tpu.memory_space<vmem>>, %arg7: memref<2x32xf32, #tpu.memory_space<vmem>>, %arg8: memref<2x32x128xf32, #tpu.memory_space<vmem>>) attributes {dimension_semantics = [#tpu.dimension_semantics<parallel>, #tpu.dimension_semantics<arbitrary>], iteration_bounds = array<i64: 1, 1>, scalar_prefetch = 0 : i64, scratch_operands = 1 : i64, tpu.core_type = #tpu.core_type<tc>, window_params = [{transform_indices = @transform_0, window_bounds = array<i64: 2, 32, 256>}, {pipeline_mode = #tpu.pipeline_mode<synchronous>, transform_indices = @transform_1, window_bounds = array<i64: 32, 4>}, {pipeline_mode = #tpu.pipeline_mode<synchronous>, transform_indices = @transform_2, window_bounds = array<i64: 1, 4>}, {pipeline_mode = #tpu.pipeline_mode<synchronous>, transform_indices = @transform_3, window_bounds = array<i64: 4, 32>}, {pipeline_mode = #tpu.pipeline_mode<synchronous>, transform_indices = @transform_4, window_bounds = array<i64: 1, 32>}, {transform_indices = @transform_5, window_bounds = array<i64: 2, 32>}]} {
    %c0_i32 = arith.constant 0 : i32
    %0 = arith.cmpi eq, %arg1, %c0_i32 : i32
    %1 = arith.extui %0 : i1 to i32
    %c0_i32_0 = arith.constant 0 : i32
    %2 = arith.cmpi ne, %1, %c0_i32_0 : i32
    scf.if %2 {
      %cst = arith.constant 0.000000e+00 : f32
      %13 = vector.broadcast %cst : f32 to vector<2x32x128xf32>
      %c0_11 = arith.constant 0 : index
      %c0_12 = arith.constant 0 : index
      %c0_13 = arith.constant 0 : index
      %14 = vector.load %arg8[%c0_11, %c0_12, %c0_13] : memref<2x32x128xf32, #tpu.memory_space<vmem>>, vector<2x32x128xf32>
      tpu.vector_store %arg8[%c0_11, %c0_12, %c0_13], %13 {strides = array<i32>} : memref<2x32x128xf32, #tpu.memory_space<vmem>>, vector<2x32x128xf32>,
    } else {
    }
    %c0 = arith.constant 0 : index
    %c0_1 = arith.constant 0 : index
    %c0_2 = arith.constant 0 : index
    %3 = vector.load %arg2[%c0, %c0_1, %c0_2] : memref<2x32x256xf32, #tpu.memory_space<vmem>>, vector<2x32x256xf32>
    %c0_3 = arith.constant 0 : index
    %c0_4 = arith.constant 0 : index
    %c0_5 = arith.constant 0 : index
    %4 = vector.load %arg8[%c0_3, %c0_4, %c0_5] : memref<2x32x128xf32, #tpu.memory_space<vmem>>, vector<2x32x128xf32>
    %5 = vector.extract_strided_slice %3 {offsets = [0, 0, 0], sizes = [2, 32, 128], strides = [1, 1, 1]} : vector<2x32x256xf32> to vector<2x32x128xf32>
    %6 = arith.addf %4, %5 : vector<2x32x128xf32>
    %7 = vector.extract_strided_slice %3 {offsets = [0, 0, 128], sizes = [2, 32, 128], strides = [1, 1, 1]} : vector<2x32x256xf32> to vector<2x32x128xf32>
    %8 = arith.addf %6, %7 : vector<2x32x128xf32>
    %c0_6 = arith.constant 0 : index
    %c0_7 = arith.constant 0 : index
    %c0_8 = arith.constant 0 : index
    %9 = vector.load %arg8[%c0_6, %c0_7, %c0_8] : memref<2x32x128xf32, #tpu.memory_space<vmem>>, vector<2x32x128xf32>
    tpu.vector_store %arg8[%c0_6, %c0_7, %c0_8], %8 {strides = array<i32>} : memref<2x32x128xf32, #tpu.memory_space<vmem>>, vector<2x32x128xf32>,
    %c0_i32_9 = arith.constant 0 : i32
    %10 = arith.cmpi eq, %arg1, %c0_i32_9 : i32
    %11 = arith.extui %10 : i1 to i32
    %c0_i32_10 = arith.constant 0 : i32
    %12 = arith.cmpi ne, %11, %c0_i32_10 : i32
    scf.if %12 {
      %c0_11 = arith.constant 0 : index
      %c0_12 = arith.constant 0 : index
      %c0_13 = arith.constant 0 : index
      %13 = vector.load %arg8[%c0_11, %c0_12, %c0_13] : memref<2x32x128xf32, #tpu.memory_space<vmem>>, vector<2x32x128xf32>
      %cst = arith.constant dense<0.000000e+00> : vector<2x32xf32>
      %14 = vector.multi_reduction <add>, %13, %cst [2] : vector<2x32x128xf32> to vector<2x32xf32>
      %cst_14 = arith.constant 3.906250e-03 : f32
      %15 = vector.broadcast %cst_14 : f32 to vector<2x32xf32>
      %16 = arith.mulf %14, %15 : vector<2x32xf32>
      %c0_15 = arith.constant 0 : index
      %c0_16 = arith.constant 0 : index
      %17 = vector.load %arg3[%c0_15, %c0_16] : memref<32x4xf32, #tpu.memory_space<vmem>>, vector<32x4xf32>
      %cst_17 = arith.constant dense<0.000000e+00> : vector<2x4xf32>
      %18 = tpu.matmul %16, %17, %cst_17 {dimension_numbers = #tpu.dot_dimension_numbers<[1], [0], [0], [1], [0, 0, 1, 1], [], []>} : vector<2x32xf32>, vector<32x4xf32>, vector<2x4xf32> -> vector<2x4xf32>
      %c0_18 = arith.constant 0 : index
      %c0_19 = arith.constant 0 : index
      %19 = vector.load %arg4[%c0_18, %c0_19] : memref<1x4xf32, #tpu.memory_space<vmem>>, vector<1x4xf32>
      %20 = vector.broadcast %19 : vector<1x4xf32> to vector<2x4xf32>
      %21 = arith.addf %18, %20 : vector<2x4xf32>
      %cst_20 = arith.constant 0.000000e+00 : f32
      %22 = vector.broadcast %cst_20 : f32 to vector<2x4xf32>
      %23 = arith.maximumf %21, %22 : vector<2x4xf32>
      %c0_21 = arith.constant 0 : index
      %c0_22 = arith.constant 0 : index
      %24 = vector.load %arg5[%c0_21, %c0_22] : memref<4x32xf32, #tpu.memory_space<vmem>>, vector<4x32xf32>
      %cst_23 = arith.constant dense<0.000000e+00> : vector<2x32xf32>
      %25 = tpu.matmul %23, %24, %cst_23 {dimension_numbers = #tpu.dot_dimension_numbers<[1], [0], [0], [1], [0, 0, 1, 1], [], []>} : vector<2x4xf32>, vector<4x32xf32>, vector<2x32xf32> -> vector<2x32xf32>
      %c0_24 = arith.constant 0 : index
      %c0_25 = arith.constant 0 : index
      %26 = vector.load %arg6[%c0_24, %c0_25] : memref<1x32xf32, #tpu.memory_space<vmem>>, vector<1x32xf32>
      %27 = vector.broadcast %26 : vector<1x32xf32> to vector<2x32xf32>
      %28 = arith.addf %25, %27 : vector<2x32xf32>
      %c0_26 = arith.constant 0 : index
      %c0_27 = arith.constant 0 : index
      %29 = vector.load %arg7[%c0_26, %c0_27] : memref<2x32xf32, #tpu.memory_space<vmem>>, vector<2x32xf32>
      tpu.vector_store %arg7[%c0_26, %c0_27], %28 {strides = array<i32>} : memref<2x32xf32, #tpu.memory_space<vmem>>, vector<2x32xf32>,
    } else {
    }
    return
  }
  func.func @transform_0(%arg0: i32, %arg1: i32) -> (i32, i32, i32) {
    %c0_i32 = arith.constant 0 : i32
    %c0_i32_0 = arith.constant 0 : i32
    return %arg0, %c0_i32, %arg1 : i32, i32, i32
  }
  func.func @transform_1(%arg0: i32, %arg1: i32) -> (i32, i32) {
    %c0_i32 = arith.constant 0 : i32
    %c0_i32_0 = arith.constant 0 : i32
    %c0_i32_1 = arith.constant 0 : i32
    return %c0_i32, %c0_i32_0 : i32, i32
  }
  func.func @transform_2(%arg0: i32, %arg1: i32) -> (i32, i32) {
    %c0_i32 = arith.constant 0 : i32
    %c0_i32_0 = arith.constant 0 : i32
    %c0_i32_1 = arith.constant 0 : i32
    return %c0_i32, %c0_i32_0 : i32, i32
  }
  func.func @transform_3(%arg0: i32, %arg1: i32) -> (i32, i32) {
    %c0_i32 = arith.constant 0 : i32
    %c0_i32_0 = arith.constant 0 : i32
    %c0_i32_1 = arith.constant 0 : i32
    return %c0_i32, %c0_i32_0 : i32, i32
  }
  func.func @transform_4(%arg0: i32, %arg1: i32) -> (i32, i32) {
    %c0_i32 = arith.constant 0 : i32
    %c0_i32_0 = arith.constant 0 : i32
    %c0_i32_1 = arith.constant 0 : i32
    return %c0_i32, %c0_i32_0 : i32, i32
  }
  func.func @transform_5(%arg0: i32, %arg1: i32) -> (i32, i32) {
    %c0_i32 = arith.constant 0 : i32
    %c0_i32_0 = arith.constant 0 : i32
    return %arg0, %c0_i32 : i32, i32
  }
}

</mosaic_0001>

<bundles_post_ra>
// kernel: tpu_custom_call.1
= control target key start
LH: loop header
LB: loop body
LE: loop exit
PB: predicated region body
PF: predicated region fallthrough
CT: control target
= control target key end

     0   :  { %10 = vsyncpa [#allocation4], 0  ;;  %s545_s0 = inlined_call_operand.hbm [shape: f32[2,32,256], index: 0, kind: input, shape index: {}]   ;;  %s546_s1 = inlined_call_operand.vmem [shape: f32[32,4], index: 1, kind: input, shape index: {}]   ;;  %s547_s2 = inlined_call_operand.vmem [shape: f32[1,4], index: 2, kind: input, shape index: {}]   ;;  %s548_s3 = inlined_call_operand.vmem [shape: f32[4,32], index: 3, kind: input, shape index: {}]   ;;  %s549_s4 = inlined_call_operand.vmem [shape: f32[1,32], index: 4, kind: input, shape index: {}]   ;;  %s550_s5 = inlined_call_operand.hbm [shape: f32[2,32], index: 5, kind: output, shape index: {}]  }
   0x1   :  { %11 = vsyncpa [#allocation5], 0  ;;  %s463_s18 = smov [#allocation3]   ;;  %s415_s22 = scalar_lea.hbm %s545_s0, 2048 }
   0x2   :  { %s17_s19 = sshll.u32 %s463_s18, 4  ;;  %p416_p0 = scmp.ne.s32.totalorder %s545_s0, %s415_s22  ;;  %s18_s19 = int_to_ptr.vmem [resolvable:$true] %s17_s19 }
   0x3   :  { %p419_p1 = scmp.lt.u32.totalorder %s415_s22, %s545_s0 }
   0x5   :  { %p421_p2 = pnand %p419_p1, %p416_p0 }
   0x7   :  { %424 = shalt.err (!%p421_p2)
}
   0x8   :  { %s425_s27 = scalar_lea.vmem %s18_s19, 2048  ;;  %p430_p4 = scmp.lt.s32.totalorder %s18_s19, %s18_s19 }
   0x9   :  { %p426_p3 = scmp.ne.s32.totalorder %s18_s19, %s425_s27  ;;  %p431_p5 = scmp.lt.s32.totalorder %s425_s27, %s425_s27 }
   0xb   :  { %p432_p6 = por %p431_p5, %p430_p4 }
   0xd   :  { %p433_p7 = pnand %p432_p6, %p426_p3 }
   0xf   :  { %436 = shalt.err (!%p433_p7)
}
  0x10   :  { %s464_s28 = smov 256   ;;  %s465_s29 = smov 16  }
  0x11   :  { %23 = dma.hbm_to_vmem [thread:$0]  %s545_s0, 2048, %s18_s19, [#allocation4], %s464_s28, %s464_s28, %s465_s29  }
  0x12   :  { %459 = dma.done.wait [#allocation4], 2048  }
  0x13   :  { %460 = vsyncadd [#allocation4], 4294965248  ;;  %v55_v0 = vld [vmem:[#allocation3 + $0x40] sm:$0xff]  ;;  %v56_v1 = vld [vmem:[#allocation3 + $0x48] sm:$0xff]  ;;  %v466_v27 = vmov 0.0|0.0   ;;  %vm467_vm0 = vmmov 0   ;;  %v149_v32 = vlaneseq }
  0x14   :  { %v47_v2 = vld [vmem:[#allocation3] sm:$0xff]  ;;  %v83_v3 = vadd.f32 %v56_v1, %v55_v0  ;;  %v48_v4 = vld [vmem:[#allocation3 + $0x8] sm:$0xff]  ;;  %v57_v5 = vld [vmem:[#allocation3 + $0x50] sm:$0xff]  ;;  %402 = vmatprep.subr.bf16.mxu0 %v466_v27  ;;  %v468_v31 = vmov 0.0   ;;  %vm160_vm1 = vcmask 130112   ;;  %vm167_vm2 = vcmask 195712  }
  0x15   :  { %v58_v6 = vld [vmem:[#allocation3 + $0x58] sm:$0xff]  ;;  %v79_v7 = vadd.f32 %v48_v4, %v47_v2  ;;  %v49_v8 = vld [vmem:[#allocation3 + $0x10] sm:$0xff]  ;;  %v59_v12 = vld [vmem:[#allocation3 + $0x60] sm:$0xff]  ;;  %394 = vmatprep.mubr.msk.f32.mxu0 %vm467_vm0, %v468_v31  ;;  %397 = vmatprep.subr.mxu1 %v468_v31  ;;  %v150_v34 = vand.u32 127, %v149_v32  ;;  %v152_v39 = vshrl.u32 %v149_v32, 7  ;;  %vm174_vm3 = vcmask 261312  }
  0x16   :  { %v50_v9 = vld [vmem:[#allocation3 + $0x18] sm:$0xff]  ;;  %114 = vadd.xlane.f32.xlu1 %v83_v3  ;;  %v84_v10 = vadd.f32 %v58_v6, %v57_v5  ;;  %v60_v13 = vld [vmem:[#allocation3 + $0x68] sm:$0xff]  ;;  %v51_v14 = vld [vmem:[#allocation3 + $0x20] sm:$0xff]  ;;  %399 = vmatprep.mubr.msk.f32.mxu1 %vm467_vm0, %v468_v31  ;;  %vm195_vm4 = vcmask 1041409   ;;  %vm197_vm5 = vcmask 261120   ;;  %vm283_vm6 = vcmask 1043456  }
  0x17   :  { %106 = vadd.xlane.f32.xlu0 %v79_v7  ;;  %v80_v11 = vadd.f32 %v50_v9, %v49_v8  ;;  %v52_v15 = vld [vmem:[#allocation3 + $0x28] sm:$0xff]  ;;  %v85_v16 = vadd.f32 %v60_v13, %v59_v12  ;;  %v61_v18 = vld [vmem:[#allocation3 + $0x70] sm:$0xff]  ;;  %v62_v19 = vld [vmem:[#allocation3 + $0x78] sm:$0xff]  ;;  %v155_v36 = vadd.s32 4294967288, %v150_v34  ;;  %v162_v38 = vadd.s32 4294967280, %v150_v34  ;;  %s469_s19 = smov [#allocation6]  }
  0x18   :  { %v81_v17 = vadd.f32 %v52_v15, %v51_v14  ;;  %v53_v20 = vld [vmem:[#allocation3 + $0x30] sm:$0xff]  ;;  %v54_v21 = vld [vmem:[#allocation3 + $0x38] sm:$0xff]  ;;  %v86_v22 = vadd.f32 %v62_v19, %v61_v18  ;;  %v130_v24 = vld [vmem:[%s546_s1] sm:$0xff]  ;;  %v169_v43 = vadd.s32 4294967272, %v150_v34  ;;  %v153_v47 = vsub.s32 %v150_v34, %v152_v39  ;;  %s365_s20 = sshll.u32 %s469_s19, 4  ;;  %s366_s20 = int_to_ptr.vmem [resolvable:$true] %s365_s20 }
  0x19   :  { %v82_v23 = vadd.f32 %v54_v21, %v53_v20  ;;  %v131_v25 = vld [vmem:[%s546_s1 + $0x8] sm:$0xff]  ;;  %v132_v28 = vld [vmem:[%s546_s1 + $0x10] sm:$0xff]  ;;  %v133_v29 = vld [vmem:[%s546_s1 + $0x18] sm:$0xff]  ;;  %v158_v41 = vsub.s32 %v155_v36, %v152_v39  ;;  %v165_v45 = vsub.s32 %v162_v38, %v152_v39  ;;  %vm279_vm7 = vcmask 31744   ;;  %p442_p9 = scmp.lt.s32.totalorder %s366_s20, %s366_s20 }
  0x1a   :  { %116 = vadd.xlane.f32.xlu1 %v84_v10  ;;  %v403_v26 = vpack.c.bf16 %v131_v25, %v130_v24  ;;  %v406_v30 = vpack.c.bf16 %v133_v29, %v132_v28  ;;  %v172_v54 = vsub.s32 %v169_v43, %v152_v39  ;;  %v271_v9 = vld [vmem:[%s548_s3] sm:$0xf]  ;;  %vm357_vm8 = vcmask 254976   ;;  %s437_s3 = scalar_lea.vmem %s366_s20, 32 }
  0x1b   :  { %108 = vadd.xlane.f32.xlu0 %v80_v11  ;;  %398 = vmatpush3.msk.msra.mxu1 %vm283_vm6, %v271_v9  ;;  %v374_v10 = vld [vmem:[%s547_s2] ss:$0 sm:$0xff]  ;;  %p438_p8 = scmp.ne.s32.totalorder %s366_s20, %s437_s3  ;;  %p443_p10 = scmp.lt.s32.totalorder %s437_s3, %s437_s3 }
  0x1c   :  { %404 = vmatpush3.bf16.msra.mxu0 %v403_v26  ;;  %v376_v15 = vld [vmem:[%s549_s4] ss:$0 sm:$0xff] }
  0x1d   :  { %405 = vmatprep.subr.bf16.mxu0 %v466_v27  ;;  %p444_p11 = por %p443_p10, %p442_p9 }
  0x1e   :  { %118 = vadd.xlane.f32.xlu1 %v85_v16 }
  0x1f   :  { %110 = vadd.xlane.f32.xlu0 %v81_v17  ;;  %p445_p12 = pnand %p444_p11, %p438_p8 }
  0x20   :  { %407 = vmatpush3.bf16.msra.mxu0 %v406_v30 }
  0x22   :  { %120 = vadd.xlane.f32.xlu1 %v86_v22 }
  0x23   :  { %112 = vadd.xlane.f32.xlu0 %v82_v23 }
  0xa3   :  { %v115_v33 = vpop.xlane.xlu1 %114 }
  0xa4   :  { %v107_v35 = vpop.xlane.xlu0 %106  ;;  %v126_v48 = vmul.f32 0.00390625, %v115_v33 }
  0xa5   :  { %v122_v51 = vmul.f32 0.00390625, %v107_v35 }
  0xa6   :  { %v179_v58 = vrot.slane %v126_v48, %v153_v47 }
  0xa7   :  { %v117_v37 = vpop.xlane.xlu1 %116  ;;  %v154_v62 = vrot.slane %v122_v51, %v153_v47 }
  0xa8   :  { %v109_v40 = vpop.xlane.xlu0 %108  ;;  %v127_v42 = vmul.f32 0.00390625, %v117_v37 }
  0xa9   :  { %v123_v44 = vmul.f32 0.00390625, %v109_v40 }
  0xaa   :  { %v183_v53 = vrot.slane %v127_v42, %v158_v41 }
  0xab   :  { %v119_v46 = vpop.xlane.xlu1 %118  ;;  %v159_v55 = vrot.slane %v123_v44, %v158_v41 }
  0xac   :  { %v128_v49 = vmul.f32 0.00390625, %v119_v46  ;;  %v111_v50 = vpop.xlane.xlu0 %110  ;;  %v184_v0 = vsel %vm160_vm1, %v183_v53, %v179_v58 }
  0xad   :  { %v124_v52 = vmul.f32 0.00390625, %v111_v50  ;;  %v161_v2 = vsel %vm160_vm1, %v159_v55, %v154_v62 }
  0xae   :  { %v188_v56 = vrot.slane %v128_v49, %v165_v45 }
  0xaf   :  { %v121_v57 = vpop.xlane.xlu1 %120  ;;  %v166_v59 = vrot.slane %v124_v52, %v165_v45 }
  0xb0   :  { %v129_v60 = vmul.f32 0.00390625, %v121_v57  ;;  %v113_v61 = vpop.xlane.xlu0 %112  ;;  %v189_v3 = vsel %vm167_vm2, %v188_v56, %v184_v0 }
  0xb1   :  { %v125_v63 = vmul.f32 0.00390625, %v113_v61  ;;  %v168_v5 = vsel %vm167_vm2, %v166_v59, %v161_v2 }
  0xb2   :  { %v193_v1 = vrot.slane %v129_v60, %v172_v54 }
  0xb3   :  { %v173_v4 = vrot.slane %v125_v63, %v172_v54 }
  0xb4   :  { %v194_v6 = vsel %vm174_vm3, %v193_v1, %v189_v3 }
  0xb5   :  { %v175_v7 = vsel %vm174_vm3, %v173_v4, %v168_v5 }
  0xb6   :  { %v196_v8 = vsel %vm195_vm4, %v194_v6, %v175_v7 }
  0xb7   :  { %395 = vmatmul.mubr.msk.f32.vlgmr.msra.gmra.mrb[0].mxu0 %vm197_vm5, %v196_v8 }
 0x18a   :  { %v266_v11 = vpop.f32.mrb[0].mxu0 }
 0x18b   :  { %v267_v12 = vadd.f32 %v374_v10, %v266_v11  ;;  %v396_v13 = vpop.f32.mrb[1].mxu0 }
 0x18d   :  { %v270_v14 = vmax.f32 %v267_v12, 0.0 }
 0x18f   :  { %400 = vmatmul.mubr.msk.f32.vlgmr.msra.gmra.mrb[0].mxu1 %vm279_vm7, %v270_v14 }
 0x262   :  { %v353_v16 = vpop.f32.mrb[0].mxu1 }
 0x263   :  { %v354_v17 = vadd.f32 %v376_v15, %v353_v16  ;;  %v401_v18 = vpop.f32.mrb[1].mxu1 }
 0x265   :  { %358 = vst.msk [vmem:[#allocation6] sm:$0x3] %vm357_vm8, %v354_v17 }
 0x266   :  { %448 = shalt.err (!%p445_p12)
}
 0x267   :  { %s449_s22 = scalar_lea.hbm %s550_s5, 32 }
 0x268   :  { %p450_p13 = scmp.ne.s32.totalorder %s550_s5, %s449_s22  ;;  %p453_p0 = scmp.lt.u32.totalorder %s449_s22, %s550_s5 }
 0x26a   :  { %p455_p1 = pnand %p453_p0, %p450_p13 }
 0x26c   :  { %458 = shalt.err (!%p455_p1)
}
 0x26d   :  { %368 = dma.vmem_to_hbm [thread:$0]  %s366_s20, 32, %s550_s5, [#allocation5]  }
 0x26e   :  { %461 = dma.done.wait [#allocation5], 32  }
 0x26f   :  { %462 = vsyncadd [#allocation5], 4294967264 }
 0x270   :  { %372 = vsyncpa [#allocation4], 1 }
 0x271   :  { %373 = vsyncpa [#allocation5], 1 }

</bundles_post_ra>
